<compile_context>
chip_gen: v7x
topology: tpu7x:2x2x1
jax: 0.10.0
libtpu: 0.0.40
codegen_flags: <defaults>
</compile_context>

<pallas_src>
import functools

import jax
import jax.numpy as jnp
from jax.experimental import pallas as pl
from jax.experimental.pallas import tpu as pltpu


def _qwen3_mlp_kernel(x_ref, wgu_ref, wd_ref, o_ref, acc_ref, *, ti):
    # x_ref:   (tm, H)     token tile (input dtype, fed straight to the MXU)
    # wgu_ref: (H, 2*ti)   packed [gate slab k | up slab k] of W_gate_up^T
    # wd_ref:  (ti, H)     row slab of W_down^T
    # o_ref:   (tm, H)     output tile (written on the last reduction step)
    # acc_ref: (tm, H)     f32 VMEM accumulator, resident across the k axis
    #
    # NOTE: correctness requires the reduction axis (intermediate slabs) to be
    # the LAST grid dimension and marked "arbitrary" in dimension_semantics.
    k = pl.program_id(1)
    n_k = pl.num_programs(1)

    @pl.when(k == 0)
    def _init():
        acc_ref[...] = jnp.zeros_like(acc_ref)

    x = x_ref[...]
    # One wide matmul over the packed gate|up slab; split with static,
    # 128-aligned lane slices.
    gu = jnp.dot(x, wgu_ref[...], preferred_element_type=jnp.float32)  # (tm, 2*ti)
    gate = gu[:, :ti]
    up = gu[:, ti:]

    # SiluAndMul in f32, then back to the activation dtype for the native MXU
    # path.  (Deliberate serving-style precision choice: reference keeps f32.)
    act = (gate * jax.nn.sigmoid(gate) * up).astype(x_ref.dtype)
    partial = jnp.dot(act, wd_ref[...], preferred_element_type=jnp.float32)

    @pl.when(k < n_k - 1)
    def _accumulate():
        acc_ref[...] += partial

    @pl.when(k == n_k - 1)
    def _finalize():
        # Fused finalize: add the last partial directly into the output store.
        o_ref[...] = (acc_ref[...] + partial).astype(o_ref.dtype)


def _round_up(x, m):
    return ((x + m - 1) // m) * m


def _pick_tile(total, target, align):
    """Largest multiple of `align` that is <= target and divides `total`."""
    t = min(target, total)
    t = max(align, (t // align) * align)
    while t > align:
        if total % t == 0:
            return t
        t -= align
    return align


def _vmem_capacity_bytes():
    try:
        return int(pltpu.get_tpu_info().vmem_capacity_bytes)
    except Exception:
        return 64 << 20  # conservative (v7x-sized) fallback


def qwen3_mlp(x, w_gate_up_t, w_down_t, *, tm=None, ti=None, vmem_limit_bytes=None):
    """x: [T, H]; w_gate_up_t: [H, 2*I] (cols 0:I gate, I:2I up); w_down_t: [I, H]."""
    T, H = x.shape
    H2, twoI = w_gate_up_t.shape
    I, H3 = w_down_t.shape
    assert H == H2 == H3 and twoI == 2 * I
    assert I % 128 == 0, "intermediate_size must be a multiple of 128"

    cap = _vmem_capacity_bytes()
    big_vmem = cap >= (100 << 20)  # v5e/v6e have 128 MiB; v7x has 64 MiB per TC

    # Token tile: large enough to sit on the MXU roofline for prefill (weights
    # are streamed once per token tile, so intensity ~ tm FLOP / weight byte:
    # need ~655 on v6e, ~311 on v7x, ~240 on v5e).  Keep tm large on v5e too.
    # Intermediate tile: sized so double-buffered weight slabs fit VMEM.
    if tm is None:
        tm = 1024 if big_vmem else 512
    if ti is None:
        ti = 1024 if big_vmem else 256

    # 16-aligned token tile (bf16 sublane packing); ragged T is padded below,
    # never promoted to a single full-T tile.
    tm = min(tm, _round_up(T, 16))
    tm = max(16, (tm // 16) * 16)
    ti = _pick_tile(I, ti, 128)

    act_bytes = jnp.dtype(x.dtype).itemsize
    w_bytes = jnp.dtype(w_gate_up_t.dtype).itemsize

    def vmem_needed(tm_, ti_):
        per_step = (tm_ * H * act_bytes        # x tile
                    + H * (2 * ti_) * w_bytes  # packed gate|up weight slab
                    + ti_ * H * w_bytes        # down weight slab
                    + tm_ * H * act_bytes)     # output tile
        return 2 * per_step + tm_ * H * 4 + (6 << 20)  # dbl-buffer + f32 acc + slack

    budget = cap - (8 << 20)
    for _ in range(8):
        if vmem_needed(tm, ti) <= budget:
            break
        if ti > 128:
            ti = _pick_tile(I, max(128, ti // 2), 128)  # shrink weight slab first
        elif tm > 16:
            tm = max(16, ((tm // 2) // 16) * 16)        # only then the token tile
        else:
            break

    # v7x has two TensorCores: make sure the 'parallel' token axis has >= 2
    # tiles so decode / small-T work shards across both cores.
    if (not big_vmem) and tm >= 32 and _round_up(T, tm) // tm < 2:
        tm = max(16, ((tm // 2) // 16) * 16)

    T_pad = _round_up(T, tm)
    if T_pad != T:
        x = jnp.pad(x, ((0, T_pad - T), (0, 0)))

    n_k = I // ti
    grid = (T_pad // tm, n_k)

    # Pack W_gate_up^T so gate slab k and up slab k are adjacent -> one weight
    # stream per step.  (One-time layout op; pre-pack offline in a real server.)
    wgu_packed = (w_gate_up_t.reshape(H, 2, n_k, ti)
                  .transpose(0, 2, 1, 3)
                  .reshape(H, 2 * I))

    if vmem_limit_bytes is None:
        vmem_limit_bytes = int(max(32 << 20, min(vmem_needed(tm, ti), budget)))

    kernel = pl.pallas_call(
        functools.partial(_qwen3_mlp_kernel, ti=ti),
        out_shape=jax.ShapeDtypeStruct((T_pad, H), x.dtype),
        grid_spec=pltpu.PrefetchScalarGridSpec(
            num_scalar_prefetch=0,
            grid=grid,
            in_specs=[
                pl.BlockSpec((tm, H), lambda i, k: (i, 0)),       # x token tile
                pl.BlockSpec((H, 2 * ti), lambda i, k: (0, k)),   # packed gate|up slab
                pl.BlockSpec((ti, H), lambda i, k: (k, 0)),       # down rows
            ],
            out_specs=pl.BlockSpec((tm, H), lambda i, k: (i, 0)),
            scratch_shapes=[pltpu.VMEM((tm, H), jnp.float32)],
        ),
        compiler_params=pltpu.CompilerParams(
            # Reduction axis (k over intermediate slabs) MUST stay last + arbitrary.
            dimension_semantics=("parallel", "arbitrary"),
            vmem_limit_bytes=vmem_limit_bytes,
        ),
    )
    out = kernel(x, wgu_packed, w_down_t)
    if T_pad != T:
        out = out[:T]
    return out


def qwen3_mlp_reference(x, w_gate_up_t, w_down_t):
    I = w_down_t.shape[0]
    gu = x.astype(jnp.float32) @ w_gate_up_t.astype(jnp.float32)
    gate, up = gu[:, :I], gu[:, I:]
    act = gate * jax.nn.sigmoid(gate) * up
    return (act @ w_down_t.astype(jnp.float32)).astype(x.dtype)


if __name__ == "__main__":
    # Small, TPU-friendly shapes consistent with the module:
    # batch=2, seq=8, hidden_size=128, intermediate_size=256
    batch, seq, hidden, intermediate = 2, 8, 128, 256

    key = jax.random.PRNGKey(0)
    kx, kg, kd = jax.random.split(key, 3)

    x = jax.random.normal(kx, (batch, seq, hidden), dtype=jnp.float32)
    # nn.Linear weight is [out, in]; we store transposed for row-major matmuls.
    w_gate_up = jax.random.normal(kg, (2 * intermediate, hidden), dtype=jnp.float32) * 0.02
    w_down = jax.random.normal(kd, (hidden, intermediate), dtype=jnp.float32) * 0.02

    w_gate_up_t = w_gate_up.T  # [H, 2I]
    w_down_t = w_down.T        # [I, H]

    x2d = x.reshape(batch * seq, hidden)  # flatten tokens

    # f32 correctness check (tight tolerance)
    out = jax.block_until_ready(qwen3_mlp(x2d, w_gate_up_t, w_down_t))
    ref = qwen3_mlp_reference(x2d, w_gate_up_t, w_down_t)
    assert out.shape == (batch * seq, hidden)
    assert jnp.allclose(out, ref, atol=1e-4, rtol=1e-4), "f32 mismatch vs reference"

    # bf16 path (native MXU dtype for real deployments), loose tolerance
    xb = x2d.astype(jnp.bfloat16)
    wgub = w_gate_up_t.astype(jnp.bfloat16)
    wdb = w_down_t.astype(jnp.bfloat16)
    outb = jax.block_until_ready(qwen3_mlp(xb, wgub, wdb))
    refb = qwen3_mlp_reference(xb, wgub, wdb)
    assert outb.shape == (batch * seq, hidden)
    assert jnp.allclose(outb.astype(jnp.float32), refb.astype(jnp.float32),
                        atol=2e-2, rtol=2e-2), "bf16 mismatch vs reference"

    # Ragged-T path exercises the padding logic (T not a multiple of 16).
    xr = x2d[:13]
    outr = jax.block_until_ready(qwen3_mlp(xr, w_gate_up_t, w_down_t))
    refr = qwen3_mlp_reference(xr, w_gate_up_t, w_down_t)
    assert outr.shape == (13, hidden)
    assert jnp.allclose(outr, refr, atol=1e-4, rtol=1e-4), "ragged-T mismatch"

    # reshape back to [batch, seq, hidden] as the module would return
    _ = out.reshape(batch, seq, hidden)

    print("KERNEL_OK")
</pallas_src>

<mosaic_0001>
module attributes {stable_mosaic.version = 11 : i64} {
  func.func @_qwen3_mlp_kernel(%arg0: i32, %arg1: i32, %arg2: memref<16x128xf32, #tpu.memory_space<vmem>>, %arg3: memref<128x512xf32, #tpu.memory_space<vmem>>, %arg4: memref<256x128xf32, #tpu.memory_space<vmem>>, %arg5: memref<16x128xf32, #tpu.memory_space<vmem>>, %arg6: memref<16x128xf32, #tpu.memory_space<vmem>>) attributes {dimension_semantics = [#tpu.dimension_semantics<parallel>, #tpu.dimension_semantics<arbitrary>], iteration_bounds = array<i64: 1, 1>, scalar_prefetch = 0 : i64, scratch_operands = 1 : i64, tpu.core_type = #tpu.core_type<tc>, window_params = [{transform_indices = @transform_0, window_bounds = array<i64: 16, 128>}, {transform_indices = @transform_1, window_bounds = array<i64: 128, 512>}, {transform_indices = @transform_2, window_bounds = array<i64: 256, 128>}, {transform_indices = @transform_3, window_bounds = array<i64: 16, 128>}]} {
    %c0_i32 = arith.constant 0 : i32
    %0 = arith.cmpi eq, %arg1, %c0_i32 : i32
    %1 = arith.extui %0 : i1 to i32
    %c0_i32_0 = arith.constant 0 : i32
    %2 = arith.cmpi ne, %1, %c0_i32_0 : i32
    scf.if %2 {
      %cst_12 = arith.constant 0.000000e+00 : f32
      %23 = vector.broadcast %cst_12 : f32 to vector<16x128xf32>
      %c0_13 = arith.constant 0 : index
      %c0_14 = arith.constant 0 : index
      %24 = vector.load %arg6[%c0_13, %c0_14] : memref<16x128xf32, #tpu.memory_space<vmem>>, vector<16x128xf32>
      tpu.vector_store %arg6[%c0_13, %c0_14], %23 {strides = array<i32>} : memref<16x128xf32, #tpu.memory_space<vmem>>, vector<16x128xf32>,
    } else {
    }
    %c0 = arith.constant 0 : index
    %c0_1 = arith.constant 0 : index
    %3 = vector.load %arg2[%c0, %c0_1] : memref<16x128xf32, #tpu.memory_space<vmem>>, vector<16x128xf32>
    %c0_2 = arith.constant 0 : index
    %c0_3 = arith.constant 0 : index
    %4 = vector.load %arg3[%c0_2, %c0_3] : memref<128x512xf32, #tpu.memory_space<vmem>>, vector<128x512xf32>
    %cst = arith.constant dense<0.000000e+00> : vector<16x512xf32>
    %5 = tpu.matmul %3, %4, %cst {dimension_numbers = #tpu.dot_dimension_numbers<[1], [0], [0], [1], [0, 0, 1, 1], [], []>} : vector<16x128xf32>, vector<128x512xf32>, vector<16x512xf32> -> vector<16x512xf32>
    %6 = vector.extract_strided_slice %5 {offsets = [0, 0], sizes = [16, 256], strides = [1, 1]} : vector<16x512xf32> to vector<16x256xf32>
    %7 = vector.extract_strided_slice %5 {offsets = [0, 256], sizes = [16, 256], strides = [1, 1]} : vector<16x512xf32> to vector<16x256xf32>
    %8 = arith.negf %6 : vector<16x256xf32>
    %9 = math.exp %8 : vector<16x256xf32>
    %cst_4 = arith.constant 1.000000e+00 : f32
    %10 = vector.broadcast %cst_4 : f32 to vector<16x256xf32>
    %11 = arith.addf %10, %9 : vector<16x256xf32>
    %12 = arith.divf %10, %11 : vector<16x256xf32>
    %13 = arith.mulf %6, %12 : vector<16x256xf32>
    %14 = arith.mulf %13, %7 : vector<16x256xf32>
    %c0_5 = arith.constant 0 : index
    %c0_6 = arith.constant 0 : index
    %15 = vector.load %arg4[%c0_5, %c0_6] : memref<256x128xf32, #tpu.memory_space<vmem>>, vector<256x128xf32>
    %cst_7 = arith.constant dense<0.000000e+00> : vector<16x128xf32>
    %16 = tpu.matmul %14, %15, %cst_7 {dimension_numbers = #tpu.dot_dimension_numbers<[1], [0], [0], [1], [0, 0, 1, 1], [], []>} : vector<16x256xf32>, vector<256x128xf32>, vector<16x128xf32> -> vector<16x128xf32>
    %c0_i32_8 = arith.constant 0 : i32
    %17 = arith.cmpi slt, %arg1, %c0_i32_8 : i32
    %18 = arith.extui %17 : i1 to i32
    %c0_i32_9 = arith.constant 0 : i32
    %19 = arith.cmpi ne, %18, %c0_i32_9 : i32
    scf.if %19 {
      %c0_12 = arith.constant 0 : index
      %c0_13 = arith.constant 0 : index
      %23 = vector.load %arg6[%c0_12, %c0_13] : memref<16x128xf32, #tpu.memory_space<vmem>>, vector<16x128xf32>
      %24 = arith.addf %23, %16 : vector<16x128xf32>
      %c0_14 = arith.constant 0 : index
      %c0_15 = arith.constant 0 : index
      %25 = vector.load %arg6[%c0_14, %c0_15] : memref<16x128xf32, #tpu.memory_space<vmem>>, vector<16x128xf32>
      tpu.vector_store %arg6[%c0_14, %c0_15], %24 {strides = array<i32>} : memref<16x128xf32, #tpu.memory_space<vmem>>, vector<16x128xf32>,
    } else {
    }
    %c0_i32_10 = arith.constant 0 : i32
    %20 = arith.cmpi eq, %arg1, %c0_i32_10 : i32
    %21 = arith.extui %20 : i1 to i32
    %c0_i32_11 = arith.constant 0 : i32
    %22 = arith.cmpi ne, %21, %c0_i32_11 : i32
    scf.if %22 {
      %c0_12 = arith.constant 0 : index
      %c0_13 = arith.constant 0 : index
      %23 = vector.load %arg6[%c0_12, %c0_13] : memref<16x128xf32, #tpu.memory_space<vmem>>, vector<16x128xf32>
      %24 = arith.addf %23, %16 : vector<16x128xf32>
      %c0_14 = arith.constant 0 : index
      %c0_15 = arith.constant 0 : index
      %25 = vector.load %arg5[%c0_14, %c0_15] : memref<16x128xf32, #tpu.memory_space<vmem>>, vector<16x128xf32>
      tpu.vector_store %arg5[%c0_14, %c0_15], %24 {strides = array<i32>} : memref<16x128xf32, #tpu.memory_space<vmem>>, vector<16x128xf32>,
    } else {
    }
    return
  }
  func.func @transform_0(%arg0: i32, %arg1: i32) -> (i32, i32) {
    %c0_i32 = arith.constant 0 : i32
    %c0_i32_0 = arith.constant 0 : i32
    return %arg0, %c0_i32 : i32, i32
  }
  func.func @transform_1(%arg0: i32, %arg1: i32) -> (i32, i32) {
    %c0_i32 = arith.constant 0 : i32
    %c0_i32_0 = arith.constant 0 : i32
    return %c0_i32, %arg1 : i32, i32
  }
  func.func @transform_2(%arg0: i32, %arg1: i32) -> (i32, i32) {
    %c0_i32 = arith.constant 0 : i32
    %c0_i32_0 = arith.constant 0 : i32
    return %arg1, %c0_i32 : i32, i32
  }
  func.func @transform_3(%arg0: i32, %arg1: i32) -> (i32, i32) {
    %c0_i32 = arith.constant 0 : i32
    %c0_i32_0 = arith.constant 0 : i32
    return %arg0, %c0_i32 : i32, i32
  }
}

</mosaic_0001>

<bundles_post_ra>
// kernel: tpu_custom_call.1
= control target key start
LH: loop header
LB: loop body
LE: loop exit
PB: predicated region body
PF: predicated region fallthrough
CT: control target
= control target key end

     0   :  { %8 = vsyncpa [#allocation4], 0  ;;  %s821_s0 = inlined_call_operand.hbm [shape: f32[16,128], index: 0, kind: input, shape index: {}]   ;;  %s822_s1 = inlined_call_operand.hbm [shape: f32[128,512], index: 1, kind: input, shape index: {}]   ;;  %s823_s2 = inlined_call_operand.hbm [shape: f32[256,128], index: 2, kind: input, shape index: {}]   ;;  %s824_s3 = inlined_call_operand.hbm [shape: f32[16,128], index: 3, kind: output, shape index: {}]  }
   0x1   :  { %9 = vsyncpa [#allocation7], 0 }
   0x2   :  { %10 = vsyncpa [#allocation5], 0  ;;  %s731_s12 = smov [#allocation6]   ;;  %s637_s16 = scalar_lea.hbm %s822_s1, 8192 }
   0x3   :  { %s28_s13 = sshll.u32 %s731_s12, 4  ;;  %p638_p0 = scmp.ne.s32.totalorder %s822_s1, %s637_s16  ;;  %s29_s13 = int_to_ptr.vmem [resolvable:$true] %s28_s13 }
   0x4   :  { %p641_p1 = scmp.lt.u32.totalorder %s637_s16, %s822_s1 }
   0x6   :  { %p643_p2 = pnand %p641_p1, %p638_p0 }
   0x8   :  { %646 = shalt.err (!%p643_p2)
}
   0x9   :  { %s647_s21 = scalar_lea.vmem %s29_s13, 8192  ;;  %p652_p4 = scmp.lt.s32.totalorder %s29_s13, %s29_s13 }
   0xa   :  { %p648_p3 = scmp.ne.s32.totalorder %s29_s13, %s647_s21  ;;  %p653_p5 = scmp.lt.s32.totalorder %s647_s21, %s647_s21 }
   0xc   :  { %p654_p6 = por %p653_p5, %p652_p4 }
   0xe   :  { %p655_p7 = pnand %p654_p6, %p648_p3 }
  0x10   :  { %658 = shalt.err (!%p655_p7)
}
  0x11   :  { %s732_s22 = smov 512   ;;  %s733_s23 = smov 32  }
  0x12   :  { %34 = dma.hbm_to_vmem [thread:$0]  %s822_s1, 8192, %s29_s13, [#allocation7], %s732_s22, %s732_s22, %s733_s23  }
  0x13   :  { %s734_s26 = smov [#allocation3]   ;;  %s659_s30 = scalar_lea.hbm %s821_s0, 256 }
  0x14   :  { %s16_s27 = sshll.u32 %s734_s26, 4  ;;  %p660_p8 = scmp.ne.s32.totalorder %s821_s0, %s659_s30  ;;  %s17_s27 = int_to_ptr.vmem [resolvable:$true] %s16_s27 }
  0x15   :  { %p663_p9 = scmp.lt.u32.totalorder %s659_s30, %s821_s0 }
  0x17   :  { %p665_p10 = pnand %p663_p9, %p660_p8 }
  0x19   :  { %668 = shalt.err (!%p665_p10)
}
  0x1a   :  { %s669_s8 = scalar_lea.vmem %s17_s27, 256  ;;  %p674_p12 = scmp.lt.s32.totalorder %s17_s27, %s17_s27 }
  0x1b   :  { %p670_p11 = scmp.ne.s32.totalorder %s17_s27, %s669_s8  ;;  %p675_p13 = scmp.lt.s32.totalorder %s669_s8, %s669_s8 }
  0x1d   :  { %p676_p0 = por %p675_p13, %p674_p12 }
  0x1f   :  { %p677_p1 = pnand %p676_p0, %p670_p11 }
  0x21   :  { %680 = shalt.err (!%p677_p1)
}
  0x22   :  { %s735_s1 = smov 128   ;;  %s736_s9 = smov 8  }
  0x23   :  { %22 = dma.hbm_to_vmem [thread:$0]  %s821_s0, 256, %s17_s27, [#allocation4], %s735_s1, %s735_s1, %s736_s9  }
  0x24   :  { %s737_s12 = smov [#allocation8]   ;;  %s681_s16 = scalar_lea.hbm %s823_s2, 4096 }
  0x25   :  { %s40_s13 = sshll.u32 %s737_s12, 4  ;;  %p682_p2 = scmp.ne.s32.totalorder %s823_s2, %s681_s16  ;;  %s41_s13 = int_to_ptr.vmem [resolvable:$true] %s40_s13 }
  0x26   :  { %p685_p3 = scmp.lt.u32.totalorder %s681_s16, %s823_s2 }
  0x28   :  { %p687_p4 = pnand %p685_p3, %p682_p2 }
  0x2a   :  { %690 = shalt.err (!%p687_p4)
}
  0x2b   :  { %s691_s21 = scalar_lea.vmem %s41_s13, 4096  ;;  %p696_p6 = scmp.lt.s32.totalorder %s41_s13, %s41_s13 }
  0x2c   :  { %p692_p5 = scmp.ne.s32.totalorder %s41_s13, %s691_s21  ;;  %p697_p7 = scmp.lt.s32.totalorder %s691_s21, %s691_s21 }
  0x2e   :  { %p698_p8 = por %p697_p7, %p696_p6 }
  0x30   :  { %p699_p9 = pnand %p698_p8, %p692_p5 }
  0x32   :  { %702 = shalt.err (!%p699_p9)
}
  0x33   :  { %46 = dma.hbm_to_vmem [thread:$0]  %s823_s2, 4096, %s41_s13, [#allocation7], %s735_s1, %s735_s1, %s736_s9  }
  0x34   :  { %725 = dma.done.wait [#allocation4], 256  }
  0x35   :  { %726 = vsyncadd [#allocation4], 4294967040 }
  0x36   :  { %727 = dma.done.wait [#allocation7], 12288  }
  0x37   :  { %728 = vsyncadd [#allocation7], 4294955008  ;;  %v738_v0 = vmov 0.0   ;;  %v65_v1 = vld [vmem:[#allocation6 + $0x8] sm:$0xff]  ;;  %v64_v3 = vld [vmem:[#allocation6] sm:$0xff]  ;;  %s739_s2 = smov [#allocation9]  }
  0x38   :  { %192 = vmatprep.mubr.f32.mxu0 %v738_v0  ;;  %269 = vmatprep.mubr.f32.mxu1 %v738_v0  ;;  %v69_v2 = vld [vmem:[#allocation6 + $0x28] sm:$0xff]  ;;  %v68_v5 = vld [vmem:[#allocation6 + $0x20] sm:$0xff]  ;;  %v67_v24 = vld [vmem:[#allocation6 + $0x18] sm:$0xff]  ;;  %s445_s23 = sshll.u32 %s739_s2, 4  ;;  %s446_s23 = int_to_ptr.vmem [resolvable:$true] %s445_s23 }
  0x39   :  { %v500_v4 = vpack.c.bf16 %v69_v2, %v65_v1  ;;  %v73_v6 = vld [vmem:[#allocation6 + $0x48] sm:$0xff]  ;;  %v502_v8 = vpack.c.bf16 %v68_v5, %v64_v3  ;;  %v72_v10 = vld [vmem:[#allocation6 + $0x40] sm:$0xff]  ;;  %v71_v25 = vld [vmem:[#allocation6 + $0x38] sm:$0xff]  ;;  %s703_s24 = scalar_lea.vmem %s446_s23, 256  ;;  %p708_p11 = scmp.lt.s32.totalorder %s446_s23, %s446_s23 }
  0x3a   :  { %v77_v7 = vld [vmem:[#allocation6 + $0x68] sm:$0xff]  ;;  %v76_v11 = vld [vmem:[#allocation6 + $0x60] sm:$0xff]  ;;  %v532_v28 = vpack.c.bf16 %v71_v25, %v67_v24  ;;  %v66_v29 = vld [vmem:[#allocation6 + $0x10] sm:$0xff]  ;;  %p704_p10 = scmp.ne.s32.totalorder %s446_s23, %s703_s24  ;;  %p709_p12 = scmp.lt.s32.totalorder %s703_s24, %s703_s24 }
  0x3b   :  { %v504_v9 = vpack.c.bf16 %v77_v7, %v73_v6  ;;  %v81_v12 = vld [vmem:[#allocation6 + $0x88] sm:$0xff]  ;;  %501 = vmatprep.subr.bf16.mxu0 %v500_v4  ;;  %v506_v14 = vpack.c.bf16 %v76_v11, %v72_v10  ;;  %v80_v16 = vld [vmem:[#allocation6 + $0x80] sm:$0xff]  ;;  %v70_v31 = vld [vmem:[#allocation6 + $0x30] sm:$0xff] }
  0x3c   :  { %v85_v13 = vld [vmem:[#allocation6 + $0xa8] sm:$0xff]  ;;  %503 = vmatpush1.bf16.msra.mxu0 %v502_v8  ;;  %v84_v17 = vld [vmem:[#allocation6 + $0xa0] sm:$0xff]  ;;  %533 = vmatprep.subr.bf16.mxu1 %v532_v28  ;;  %v534_v34 = vpack.c.bf16 %v70_v31, %v66_v29  ;;  %v75_v35 = vld [vmem:[#allocation6 + $0x58] sm:$0xff]  ;;  %p710_p13 = por %p709_p12, %p708_p11 }
  0x3d   :  { %505 = vmatprep.subr.bf16.mxu0 %v504_v9  ;;  %v508_v15 = vpack.c.bf16 %v85_v13, %v81_v12  ;;  %v89_v18 = vld [vmem:[#allocation6 + $0xc8] sm:$0xff]  ;;  %v510_v20 = vpack.c.bf16 %v84_v17, %v80_v16  ;;  %v88_v21 = vld [vmem:[#allocation6 + $0xc0] sm:$0xff]  ;;  %v79_v36 = vld [vmem:[#allocation6 + $0x78] sm:$0xff] }
  0x3e   :  { %v93_v19 = vld [vmem:[#allocation6 + $0xe8] sm:$0xff]  ;;  %v92_v23 = vld [vmem:[#allocation6 + $0xe0] sm:$0xff]  ;;  %v536_v38 = vpack.c.bf16 %v79_v36, %v75_v35  ;;  %v74_v39 = vld [vmem:[#allocation6 + $0x50] sm:$0xff]  ;;  %535 = vmatpush1.bf16.msra.mxu1 %v534_v34  ;;  %p711_p0 = pnand %p710_p13, %p704_p10 }
  0x3f   :  { %v512_v22 = vpack.c.bf16 %v93_v19, %v89_v18  ;;  %v97_v26 = vld [vmem:[#allocation6 + $0x108] sm:$0xff]  ;;  %v96_v30 = vld [vmem:[#allocation6 + $0x100] sm:$0xff]  ;;  %v514_v32 = vpack.c.bf16 %v92_v23, %v88_v21  ;;  %v78_v40 = vld [vmem:[#allocation6 + $0x70] sm:$0xff] }
  0x40   :  { %507 = vmatpush1.bf16.msra.mxu0 %v506_v14  ;;  %v101_v27 = vld [vmem:[#allocation6 + $0x128] sm:$0xff]  ;;  %v100_v33 = vld [vmem:[#allocation6 + $0x120] sm:$0xff]  ;;  %v83_v41 = vld [vmem:[#allocation6 + $0x98] sm:$0xff]  ;;  %v538_v44 = vpack.c.bf16 %v78_v40, %v74_v39  ;;  %537 = vmatprep.subr.bf16.mxu1 %v536_v38 }
  0x41   :  { %509 = vmatprep.subr.bf16.mxu0 %v508_v15  ;;  %v516_v37 = vpack.c.bf16 %v101_v27, %v97_v26  ;;  %v105_v42 = vld [vmem:[#allocation6 + $0x148] sm:$0xff]  ;;  %v87_v45 = vld [vmem:[#allocation6 + $0xb8] sm:$0xff]  ;;  %v82_v47 = vld [vmem:[#allocation6 + $0x90] sm:$0xff]  ;;  %v518_v49 = vpack.c.bf16 %v100_v33, %v96_v30 }
  0x42   :  { %v109_v43 = vld [vmem:[#allocation6 + $0x168] sm:$0xff]  ;;  %v540_v46 = vpack.c.bf16 %v87_v45, %v83_v41  ;;  %v86_v48 = vld [vmem:[#allocation6 + $0xb0] sm:$0xff]  ;;  %v91_v50 = vld [vmem:[#allocation6 + $0xd8] sm:$0xff]  ;;  %539 = vmatpush1.bf16.msra.mxu1 %v538_v44 }
  0x43   :  { %v95_v51 = vld [vmem:[#allocation6 + $0xf8] sm:$0xff]  ;;  %v520_v52 = vpack.c.bf16 %v109_v43, %v105_v42  ;;  %v104_v53 = vld [vmem:[#allocation6 + $0x140] sm:$0xff]  ;;  %v113_v55 = vld [vmem:[#allocation6 + $0x188] sm:$0xff]  ;;  %v542_v57 = vpack.c.bf16 %v86_v48, %v82_v47 }
  0x44   :  { %511 = vmatpush1.bf16.msra.mxu0 %v510_v20  ;;  %v108_v54 = vld [vmem:[#allocation6 + $0x160] sm:$0xff]  ;;  %v117_v56 = vld [vmem:[#allocation6 + $0x1a8] sm:$0xff]  ;;  %541 = vmatprep.subr.bf16.mxu1 %v540_v46  ;;  %v544_v58 = vpack.c.bf16 %v95_v51, %v91_v50  ;;  %v90_v59 = vld [vmem:[#allocation6 + $0xd0] sm:$0xff] }
  0x45   :  { %513 = vmatprep.subr.bf16.mxu0 %v512_v22  ;;  %v94_v60 = vld [vmem:[#allocation6 + $0xf0] sm:$0xff]  ;;  %v522_v61 = vpack.c.bf16 %v108_v54, %v104_v53  ;;  %v99_v62 = vld [vmem:[#allocation6 + $0x118] sm:$0xff]  ;;  %v524_v1 = vpack.c.bf16 %v117_v56, %v113_v55  ;;  %v112_v2 = vld [vmem:[#allocation6 + $0x180] sm:$0xff] }
  0x46   :  { %v103_v63 = vld [vmem:[#allocation6 + $0x138] sm:$0xff]  ;;  %v116_v3 = vld [vmem:[#allocation6 + $0x1a0] sm:$0xff]  ;;  %v121_v4 = vld [vmem:[#allocation6 + $0x1c8] sm:$0xff]  ;;  %543 = vmatpush1.bf16.msra.mxu1 %v542_v57  ;;  %v546_v6 = vpack.c.bf16 %v94_v60, %v90_v59 }
  0x47   :  { %v125_v5 = vld [vmem:[#allocation6 + $0x1e8] sm:$0xff]  ;;  %545 = vmatprep.subr.bf16.mxu1 %v544_v58  ;;  %v548_v7 = vpack.c.bf16 %v103_v63, %v99_v62  ;;  %v98_v8 = vld [vmem:[#allocation6 + $0x110] sm:$0xff]  ;;  %v526_v10 = vpack.c.bf16 %v116_v3, %v112_v2  ;;  %v107_v11 = vld [vmem:[#allocation6 + $0x158] sm:$0xff] }
  0x48   :  { %515 = vmatpush1.bf16.msra.mxu0 %v514_v32  ;;  %v102_v9 = vld [vmem:[#allocation6 + $0x130] sm:$0xff]  ;;  %v111_v12 = vld [vmem:[#allocation6 + $0x178] sm:$0xff]  ;;  %v528_v13 = vpack.c.bf16 %v125_v5, %v121_v4  ;;  %v120_v14 = vld [vmem:[#allocation6 + $0x1c0] sm:$0xff] }
  0x49   :  { %517 = vmatprep.subr.bf16.mxu0 %v516_v37  ;;  %v124_v15 = vld [vmem:[#allocation6 + $0x1e0] sm:$0xff]  ;;  %v550_v16 = vpack.c.bf16 %v102_v9, %v98_v8  ;;  %v552_v17 = vpack.c.bf16 %v111_v12, %v107_v11  ;;  %v106_v18 = vld [vmem:[#allocation6 + $0x150] sm:$0xff]  ;;  %v115_v21 = vld [vmem:[#allocation6 + $0x198] sm:$0xff] }
  0x4a   :  { %547 = vmatpush1.bf16.msra.mxu1 %v546_v6  ;;  %v110_v19 = vld [vmem:[#allocation6 + $0x170] sm:$0xff]  ;;  %v530_v20 = vpack.c.bf16 %v124_v15, %v120_v14  ;;  %v119_v22 = vld [vmem:[#allocation6 + $0x1b8] sm:$0xff]  ;;  %v330_v36 = vld [vmem:[#allocation8 + $0x80] sm:$0xff] }
  0x4b   :  { %549 = vmatprep.subr.bf16.mxu1 %v548_v7  ;;  %v554_v23 = vpack.c.bf16 %v110_v19, %v106_v18  ;;  %v556_v24 = vpack.c.bf16 %v119_v22, %v115_v21  ;;  %v114_v25 = vld [vmem:[#allocation6 + $0x190] sm:$0xff]  ;;  %v123_v28 = vld [vmem:[#allocation6 + $0x1d8] sm:$0xff]  ;;  %v331_v37 = vld [vmem:[#allocation8 + $0x88] sm:$0xff] }
  0x4c   :  { %519 = vmatpush1.bf16.msra.mxu0 %v518_v49  ;;  %v118_v26 = vld [vmem:[#allocation6 + $0x1b0] sm:$0xff]  ;;  %v127_v29 = vld [vmem:[#allocation6 + $0x1f8] sm:$0xff]  ;;  %v564_v38 = vpack.c.bf16 %v331_v37, %v330_v36  ;;  %v314_v39 = vld [vmem:[#allocation8] sm:$0xff] }
  0x4d   :  { %521 = vmatprep.subr.bf16.mxu0 %v520_v52  ;;  %v62_v27 = vld [vmem:[#allocation3] sm:$0xff]  ;;  %v558_v30 = vpack.c.bf16 %v118_v26, %v114_v25  ;;  %v560_v31 = vpack.c.bf16 %v127_v29, %v123_v28  ;;  %v63_v34 = vld [vmem:[#allocation3 + $0x8] sm:$0xff]  ;;  %v315_v40 = vld [vmem:[#allocation8 + $0x8] sm:$0xff] }
  0x4e   :  { %551 = vmatpush1.bf16.msra.mxu1 %v550_v16  ;;  %v122_v32 = vld [vmem:[#allocation6 + $0x1d0] sm:$0xff]  ;;  %v566_v41 = vpack.c.bf16 %v315_v40, %v314_v39  ;;  %v333_v43 = vld [vmem:[#allocation8 + $0x98] sm:$0xff]  ;;  %v335_v48 = vld [vmem:[#allocation8 + $0xa8] sm:$0xff] }
  0x4f   :  { %553 = vmatprep.subr.bf16.mxu1 %v552_v17  ;;  %v126_v33 = vld [vmem:[#allocation6 + $0x1f0] sm:$0xff]  ;;  %v317_v46 = vld [vmem:[#allocation8 + $0x18] sm:$0xff]  ;;  %v318_v50 = vld [vmem:[#allocation8 + $0x20] sm:$0xff] }
  0x50   :  { %523 = vmatpush1.bf16.msra.mxu0 %v522_v61  ;;  %v562_v35 = vpack.c.bf16 %v126_v33, %v122_v32  ;;  %v332_v42 = vld [vmem:[#allocation8 + $0x90] sm:$0xff]  ;;  %v319_v51 = vld [vmem:[#allocation8 + $0x28] sm:$0xff]  ;;  %v337_v54 = vld [vmem:[#allocation8 + $0xb8] sm:$0xff] }
  0x51   :  { %525 = vmatprep.subr.bf16.mxu0 %v524_v1  ;;  %v568_v44 = vpack.c.bf16 %v333_v43, %v332_v42  ;;  %v316_v45 = vld [vmem:[#allocation8 + $0x10] sm:$0xff]  ;;  %v574_v52 = vpack.c.bf16 %v319_v51, %v318_v50  ;;  %v321_v57 = vld [vmem:[#allocation8 + $0x38] sm:$0xff]  ;;  %v338_v59 = vld [vmem:[#allocation8 + $0xc0] sm:$0xff] }
  0x52   :  { %555 = vmatpush1.bf16.msra.mxu1 %v554_v23  ;;  %v570_v47 = vpack.c.bf16 %v317_v46, %v316_v45  ;;  %v336_v53 = vld [vmem:[#allocation8 + $0xb0] sm:$0xff]  ;;  %v339_v60 = vld [vmem:[#allocation8 + $0xc8] sm:$0xff]  ;;  %v322_v62 = vld [vmem:[#allocation8 + $0x40] sm:$0xff] }
  0x53   :  { %557 = vmatprep.subr.bf16.mxu1 %v556_v24  ;;  %v576_v55 = vpack.c.bf16 %v337_v54, %v336_v53  ;;  %v320_v56 = vld [vmem:[#allocation8 + $0x30] sm:$0xff]  ;;  %v580_v61 = vpack.c.bf16 %v339_v60, %v338_v59  ;;  %v323_v63 = vld [vmem:[#allocation8 + $0x48] sm:$0xff]  ;;  %v341_v3 = vld [vmem:[#allocation8 + $0xd8] sm:$0xff] }
  0x54   :  { %527 = vmatpush1.bf16.msra.mxu0 %v526_v10  ;;  %v578_v58 = vpack.c.bf16 %v321_v57, %v320_v56  ;;  %v582_v1 = vpack.c.bf16 %v323_v63, %v322_v62  ;;  %v340_v2 = vld [vmem:[#allocation8 + $0xd0] sm:$0xff]  ;;  %v325_v6 = vld [vmem:[#allocation8 + $0x58] sm:$0xff]  ;;  %v342_v8 = vld [vmem:[#allocation8 + $0xe0] sm:$0xff] }
  0x55   :  { %529 = vmatprep.subr.bf16.mxu0 %v528_v13  ;;  %v584_v4 = vpack.c.bf16 %v341_v3, %v340_v2  ;;  %v324_v5 = vld [vmem:[#allocation8 + $0x50] sm:$0xff]  ;;  %v343_v9 = vld [vmem:[#allocation8 + $0xe8] sm:$0xff]  ;;  %v326_v11 = vld [vmem:[#allocation8 + $0x60] sm:$0xff] }
  0x56   :  { %559 = vmatpush1.bf16.msra.mxu1 %v558_v30  ;;  %v586_v7 = vpack.c.bf16 %v325_v6, %v324_v5  ;;  %v588_v10 = vpack.c.bf16 %v343_v9, %v342_v8  ;;  %v327_v12 = vld [vmem:[#allocation8 + $0x68] sm:$0xff]  ;;  %v344_v14 = vld [vmem:[#allocation8 + $0xf0] sm:$0xff]  ;;  %v345_v15 = vld [vmem:[#allocation8 + $0xf8] sm:$0xff] }
  0x57   :  { %561 = vmatprep.subr.bf16.mxu1 %v560_v31  ;;  %v590_v13 = vpack.c.bf16 %v327_v12, %v326_v11  ;;  %v592_v16 = vpack.c.bf16 %v345_v15, %v344_v14  ;;  %v328_v17 = vld [vmem:[#allocation8 + $0x70] sm:$0xff]  ;;  %v329_v18 = vld [vmem:[#allocation8 + $0x78] sm:$0xff] }
  0x58   :  { %531 = vmatpush1.bf16.msra.mxu0 %v530_v20  ;;  %v594_v19 = vpack.c.bf16 %v329_v18, %v328_v17 }
  0x59   :  { %565 = vmatprep.subr.bf16.mxu0 %v564_v38 }
  0x5a   :  { %563 = vmatpush1.bf16.msra.mxu1 %v562_v35 }
  0x5b   :  { %193 = vmatmul.mubr.f32.vlgmr.msra.gmra.mrb[0].mxu0 %v62_v27  ;;  %596 = vmatprep.subr.bf16.mxu1 %v564_v38 }
  0x5c   :  { %198 = vmatprep.mubr.f32.mxu0 %v738_v0  ;;  %567 = vmatpush3.bf16.msra.mxu0 %v566_v41 }
  0x5d   :  { %270 = vmatmul.mubr.f32.vlgmr.msra.gmra.mrb[0].mxu1 %v62_v27  ;;  %569 = vmatprep.subr.bf16.mxu0 %v568_v44 }
  0x5e   :  { %275 = vmatprep.mubr.f32.mxu1 %v738_v0  ;;  %604 = vmatpush3.bf16.msra.mxu1 %v566_v41  ;;  %v334_v0 = vld [vmem:[#allocation8 + $0xa0] sm:$0xff] }
  0x5f   :  { %199 = vmatmul.mubr.f32.gmra.mrb[2].mxu0 %v63_v34  ;;  %597 = vmatprep.subr.bf16.mxu1 %v568_v44  ;;  %v572_v49 = vpack.c.bf16 %v335_v48, %v334_v0 }
  0x60   :  { %571 = vmatpush3.bf16.msra.mxu0 %v570_v47 }
  0x61   :  { %276 = vmatmul.mubr.f32.gmra.mrb[2].mxu1 %v63_v34  ;;  %573 = vmatprep.subr.bf16.mxu0 %v572_v49 }
  0x62   :  { %605 = vmatpush3.bf16.msra.mxu1 %v570_v47 }
  0x63   :  { %598 = vmatprep.subr.bf16.mxu1 %v572_v49 }
  0x64   :  { %575 = vmatpush3.bf16.msra.mxu0 %v574_v52 }
  0x65   :  { %577 = vmatprep.subr.bf16.mxu0 %v576_v55 }
  0x66   :  { %606 = vmatpush3.bf16.msra.mxu1 %v574_v52 }
  0x67   :  { %599 = vmatprep.subr.bf16.mxu1 %v576_v55 }
  0x68   :  { %579 = vmatpush3.bf16.msra.mxu0 %v578_v58 }
  0x69   :  { %581 = vmatprep.subr.bf16.mxu0 %v580_v61 }
  0x6a   :  { %607 = vmatpush3.bf16.msra.mxu1 %v578_v58 }
  0x6b   :  { %600 = vmatprep.subr.bf16.mxu1 %v580_v61 }
  0x6c   :  { %583 = vmatpush3.bf16.msra.mxu0 %v582_v1 }
  0x6d   :  { %585 = vmatprep.subr.bf16.mxu0 %v584_v4 }
  0x6e   :  { %608 = vmatpush3.bf16.msra.mxu1 %v582_v1 }
  0x6f   :  { %601 = vmatprep.subr.bf16.mxu1 %v584_v4 }
  0x70   :  { %587 = vmatpush3.bf16.msra.mxu0 %v586_v7 }
  0x71   :  { %589 = vmatprep.subr.bf16.mxu0 %v588_v10 }
  0x72   :  { %609 = vmatpush3.bf16.msra.mxu1 %v586_v7 }
  0x73   :  { %602 = vmatprep.subr.bf16.mxu1 %v588_v10 }
  0x74   :  { %591 = vmatpush3.bf16.msra.mxu0 %v590_v13 }
  0x75   :  { %593 = vmatprep.subr.bf16.mxu0 %v592_v16 }
  0x76   :  { %610 = vmatpush3.bf16.msra.mxu1 %v590_v13 }
  0x77   :  { %603 = vmatprep.subr.bf16.mxu1 %v592_v16 }
  0x78   :  { %595 = vmatpush3.bf16.msra.mxu0 %v594_v19 }
  0x7a   :  { %611 = vmatpush3.bf16.msra.mxu1 %v594_v19 }
 0x12e   :  { %v194_v20 = vpop.f32.mrb[0].mxu0 }
 0x12f   :  { %v458_v21 = vmul.f32 -1.442695, %v194_v20  ;;  %v196_v22 = vpop.f32.mrb[1].mxu0 }
 0x130   :  { %v459_v23 = vmul.f32 -1.442695, %v196_v22  ;;  %v271_v28 = vpop.f32.mrb[0].mxu1 }
 0x131   :  { %621 = vpow2.f32 %v458_v21  ;;  %v273_v29 = vpop.f32.mrb[1].mxu1 }
 0x132   :  { %623 = vpow2.f32 %v459_v23  ;;  %v200_v24 = vpop.f32.mrb[2].mxu0 }
 0x133   :  { %v460_v25 = vmul.f32 -1.442695, %v200_v24  ;;  %v202_v26 = vpop.f32.mrb[3].mxu0 }
 0x134   :  { %v461_v27 = vmul.f32 -1.442695, %v202_v26  ;;  %v277_v33 = vpop.f32.mrb[2].mxu1 }
 0x135   :  { %625 = vpow2.f32 %v460_v25  ;;  %v279_v35 = vpop.f32.mrb[3].mxu1 }
 0x136   :  { %627 = vpow2.f32 %v461_v27 }
 0x13b   :  { %v622_v30 = vpop.eup %621 }
 0x13c   :  { %v624_v31 = vpop.eup %623  ;;  %v294_v32 = vadd.f32 1.0, %v622_v30 }
 0x13d   :  { %v295_v34 = vadd.f32 1.0, %v624_v31 }
 0x13e   :  { %629 = vrcp.f32 %v294_v32 }
 0x13f   :  { %v626_v36 = vpop.eup %625  ;;  %631 = vrcp.f32 %v295_v34 }
 0x140   :  { %v628_v37 = vpop.eup %627  ;;  %v296_v38 = vadd.f32 1.0, %v626_v36 }
 0x141   :  { %v297_v39 = vadd.f32 1.0, %v628_v37 }
 0x142   :  { %633 = vrcp.f32 %v296_v38 }
 0x143   :  { %635 = vrcp.f32 %v297_v39 }
 0x148   :  { %v630_v40 = vpop.eup %629 }
 0x149   :  { %v632_v41 = vpop.eup %631  ;;  %v306_v42 = vmul.f32 %v630_v40, %v194_v20 }
 0x14a   :  { %v307_v43 = vmul.f32 %v632_v41, %v196_v22 }
 0x14b   :  { %v310_v44 = vmul.f32 %v306_v42, %v271_v28 }
 0x14c   :  { %v634_v45 = vpop.eup %633  ;;  %v311_v46 = vmul.f32 %v307_v43, %v273_v29 }
 0x14d   :  { %v636_v47 = vpop.eup %635  ;;  %v308_v0 = vmul.f32 %v634_v45, %v200_v24 }
 0x14e   :  { %v309_v48 = vmul.f32 %v636_v47, %v202_v26  ;;  %410 = vmatprep.mubr.f32.mxu0 %v311_v46 }
 0x14f   :  { %v312_v49 = vmul.f32 %v308_v0, %v277_v33  ;;  %411 = vmatmul.mubr.f32.vlgmr.msra.gmra.mrb[4].mxu0 %v310_v44 }
 0x150   :  { %v313_v50 = vmul.f32 %v309_v48, %v279_v35 }
 0x152   :  { %415 = vmatprep.mubr.f32.mxu1 %v313_v50 }
 0x153   :  { %416 = vmatmul.mubr.f32.vlgmr.msra.gmra.mrb[4].mxu1 %v312_v49 }
 0x222   :  { %v494_v51 = vpop.f32.mrb[4].mxu0 }
 0x223   :  { %v495_v52 = vpop.f32.mrb[5].mxu0 }
 0x224   :  { %v496_v53 = vadd.f32 %v495_v52, %v494_v51 }
 0x226   :  { %438 = vst [vmem:[#allocation9] sm:$0xff] %v496_v53  ;;  %v497_v54 = vpop.f32.mrb[4].mxu1 }
 0x227   :  { %v498_v55 = vpop.f32.mrb[5].mxu1 }
 0x228   :  { %v499_v56 = vadd.f32 %v498_v55, %v497_v54 }
 0x22a   :  { %439 = vst [vmem:[#allocation9 + $0x8] sm:$0xff] %v499_v56 }
 0x22b   :  { %714 = shalt.err (!%p711_p0)
}
 0x22c   :  { %s715_s27 = scalar_lea.hbm %s824_s3, 256 }
 0x22d   :  { %p716_p1 = scmp.ne.s32.totalorder %s824_s3, %s715_s27  ;;  %p719_p2 = scmp.lt.u32.totalorder %s715_s27, %s824_s3 }
 0x22f   :  { %p721_p3 = pnand %p719_p2, %p716_p1 }
 0x231   :  { %724 = shalt.err (!%p721_p3)
}
 0x232   :  { %451 = dma.vmem_to_hbm [thread:$0]  %s446_s23, 256, %s824_s3, [#allocation5], %s735_s1, %s735_s1, %s736_s9  }
 0x233   :  { %729 = dma.done.wait [#allocation5], 256  }
 0x234   :  { %730 = vsyncadd [#allocation5], 4294967040 }
 0x235   :  { %455 = vsyncpa [#allocation4], 1 }
 0x236   :  { %456 = vsyncpa [#allocation7], 1 }
 0x237   :  { %457 = vsyncpa [#allocation5], 1 }

</bundles_post_ra>
